<compile_context>
chip_gen: v6e
topology: v6e:2x2x1
jax: 0.10.0
libtpu: 0.0.40
codegen_flags: <defaults>
</compile_context>

<pallas_src>
import functools

import numpy as np
import jax
import jax.numpy as jnp
from jax import lax
from jax.experimental import pallas as pl
from jax.experimental.pallas import tpu as pltpu


def _bottleneck_kernel(x_ref, w1_ref, w2_ref, w3_ref,
                       b1_ref, b2_ref, b3_ref, masks_ref, o_ref,
                       *, W, HW, Nb):
    """One group of Nb images, (C, Nb*HW) layout: channels on sublanes, pixels on lanes."""
    L = Nb * HW

    # ---- fold Nb images along the lane axis: (Nb, Cin, HW) -> (Cin, Nb*HW)
    if Nb == 1:
        x = x_ref[0].astype(jnp.float32)
    else:
        x = jnp.concatenate([x_ref[nb].astype(jnp.float32) for nb in range(Nb)], axis=1)

    masks = masks_ref[...]                                  # (9, L) f32 {0,1}

    # ---- conv1 (1x1, BN scale folded into weights) + bias + relu -> (P, L)
    h1 = jnp.dot(w1_ref[...], x.astype(jnp.bfloat16),
                 preferred_element_type=jnp.float32)
    h1 = jnp.maximum(h1 + b1_ref[...], 0.0)

    # ---- conv2 (3x3, stride 1, SAME): stack 9 rolled+masked taps along K -> one K=9P matmul
    taps = []
    for kh in range(3):
        for kw in range(3):
            off = (kh - 1) * W + (kw - 1)
            t = kh * 3 + kw
            if off == 0:
                taps.append(h1)
            else:
                shifted = pltpu.roll(h1, (-off) % L, 1)     # shifted[p] = h1[p + off]
                taps.append(shifted * masks[t:t + 1, :])
    stacked = jnp.concatenate(taps, axis=0).astype(jnp.bfloat16)   # (9P, L)
    h2 = jnp.dot(w2_ref[...], stacked, preferred_element_type=jnp.float32)
    h2 = jnp.maximum(h2 + b2_ref[...], 0.0)

    # ---- conv3 (1x1) + bias + identity residual + relu -> (4P, L)
    h3 = jnp.dot(w3_ref[...], h2.astype(jnp.bfloat16),
                 preferred_element_type=jnp.float32)
    h3 = h3 + b3_ref[...] + x                               # identity shortcut (Cin == 4P)
    out = jnp.maximum(h3, 0.0).astype(o_ref.dtype)          # (C4, L)

    # lane-dense per-image stores back into the NCHW layout
    for nb in range(Nb):
        o_ref[nb] = out[:, nb * HW:(nb + 1) * HW]


def _tap_masks(H, W):
    """(9, H*W) {0,1} masks: which rolled positions are valid (inside the image)."""
    py, px = np.mgrid[0:H, 0:W]
    px = px.reshape(-1)
    py = py.reshape(-1)
    m = np.zeros((9, H * W), np.float32)
    for kh in range(3):
        for kw in range(3):
            dy, dx = kh - 1, kw - 1
            valid = ((px + dx >= 0) & (px + dx < W) &
                     (py + dy >= 0) & (py + dy < H))
            m[kh * 3 + kw] = valid.astype(np.float32)
    return jnp.asarray(m)


def _pick_nb(N, HW, max_lanes=2048):
    """Largest batch fold Nb that divides N, keeps <= max_lanes lanes,
    and keeps >= 2 grid steps (for v7x's two TensorCores) when N > 1."""
    nb = 1
    for cand in range(1, N + 1):
        if N % cand != 0:
            continue
        if cand * HW > max_lanes:
            continue
        if N // cand < 2 and N > 1:
            continue
        nb = cand
    return nb


def bottleneck_forward(x_nchw, w1_oihw, w2_oihw, w3_oihw, s1, b1, s2, b2, s3, b3):
    """Bottleneck forward (stride=1, downsample=None), NCHW in/out, eval-mode (folded) BN."""
    N, Cin, H, W = x_nchw.shape
    P = w1_oihw.shape[0]
    C4 = w3_oihw.shape[0]
    assert C4 == Cin, "identity shortcut requires inplanes == planes * expansion"
    HW = H * W
    Nb = _pick_nb(N, HW)
    G = N // Nb
    L = Nb * HW

    x2 = x_nchw.reshape(N, Cin, HW)                          # free: NCHW is native layout

    # Fold BN scales into conv weights (f32, one-time host-side), then cast MXU operands to bf16.
    s1f = s1.astype(jnp.float32)
    s2f = s2.astype(jnp.float32)
    s3f = s3.astype(jnp.float32)
    w1f = (s1f[:, None] * w1_oihw.reshape(P, Cin).astype(jnp.float32)).astype(jnp.bfloat16)
    # w2: (O,I,3,3) -> (O, kh, kw, I) -> (P, 9P) so column (kh*3+kw)*P + ci matches the stacked taps.
    w2t = jnp.transpose(w2_oihw, (0, 2, 3, 1)).reshape(P, 9 * P).astype(jnp.float32)
    w2f = (s2f[:, None] * w2t).astype(jnp.bfloat16)
    w3f = (s3f[:, None] * w3_oihw.reshape(C4, P).astype(jnp.float32)).astype(jnp.bfloat16)

    b1c = b1.reshape(P, 1).astype(jnp.float32)
    b2c = b2.reshape(P, 1).astype(jnp.float32)
    b3c = b3.reshape(C4, 1).astype(jnp.float32)
    masks = jnp.tile(_tap_masks(H, W), (1, Nb))              # (9, Nb*HW)

    out = pl.pallas_call(
        functools.partial(_bottleneck_kernel, W=W, HW=HW, Nb=Nb),
        out_shape=jax.ShapeDtypeStruct((N, C4, HW), x_nchw.dtype),
        grid_spec=pltpu.PrefetchScalarGridSpec(
            num_scalar_prefetch=0,
            grid=(G,),
            in_specs=[
                pl.BlockSpec((Nb, Cin, HW), lambda g: (g, 0, 0)),   # x (Nb images per step)
                pl.BlockSpec((P, Cin), lambda g: (0, 0)),           # w1 (scale-folded, bf16)
                pl.BlockSpec((P, 9 * P), lambda g: (0, 0)),         # w2 taps stacked on K (bf16)
                pl.BlockSpec((C4, P), lambda g: (0, 0)),            # w3 (bf16)
                pl.BlockSpec((P, 1), lambda g: (0, 0)),             # b1
                pl.BlockSpec((P, 1), lambda g: (0, 0)),             # b2
                pl.BlockSpec((C4, 1), lambda g: (0, 0)),            # b3
                pl.BlockSpec((9, L), lambda g: (0, 0)),             # boundary masks
            ],
            out_specs=pl.BlockSpec((Nb, C4, HW), lambda g: (g, 0, 0)),
        ),
        compiler_params=pltpu.CompilerParams(
            dimension_semantics=("parallel",),
            # Safe on all generations (v5e default scoped VMEM is only 16 MiB);
            # re-budget if blocks grow (v7x physical VMEM is 64 MiB).
            vmem_limit_bytes=32 * 1024 * 1024,
        ),
    )(x2, w1f, w2f, w3f, b1c, b2c, b3c, masks)

    return out.reshape(N, C4, H, W)


def _fold_bn(gamma, beta, mean, var, eps=1e-5):
    scale = gamma / jnp.sqrt(var + eps)
    bias = beta - mean * scale
    return scale, bias


def _ref_bottleneck(x, w1, w2, w3, s1, b1, s2, b2, s3, b3):
    """Pure-JAX f32 reference (lax.conv, NCHW/OIHW) = module semantics."""
    dn = ("NCHW", "OIHW", "NCHW")
    prec = lax.Precision.HIGHEST

    def conv(inp, w, pad):
        dnum = lax.conv_dimension_numbers(inp.shape, w.shape, dn)
        return lax.conv_general_dilated(inp, w, (1, 1), pad,
                                        dimension_numbers=dnum, precision=prec)

    def affine(o, s, b):
        return o * s[None, :, None, None] + b[None, :, None, None]

    out = jnp.maximum(affine(conv(x, w1, "VALID"), s1, b1), 0.0)
    out = jnp.maximum(affine(conv(out, w2, "SAME"), s2, b2), 0.0)
    out = affine(conv(out, w3, "VALID"), s3, b3) + x
    return jnp.maximum(out, 0.0)


if __name__ == "__main__":
    key = jax.random.PRNGKey(0)
    N, planes, H, W = 4, 8, 16, 16
    inplanes = planes * 4          # downsample=None => inplanes == planes * expansion

    ks = jax.random.split(key, 8)
    x = jax.random.normal(ks[0], (N, inplanes, H, W), jnp.float32)

    # Conv weights in PyTorch OIHW layout.
    w1 = jax.random.normal(ks[1], (planes, inplanes, 1, 1), jnp.float32) * 0.1
    w2 = jax.random.normal(ks[2], (planes, planes, 3, 3), jnp.float32) * 0.1
    w3 = jax.random.normal(ks[3], (planes * 4, planes, 1, 1), jnp.float32) * 0.1

    def bn_params(k, C):
        k1, k2, k3, k4 = jax.random.split(k, 4)
        g = 1.0 + 0.1 * jax.random.normal(k1, (C,), jnp.float32)
        b = 0.1 * jax.random.normal(k2, (C,), jnp.float32)
        m = 0.05 * jax.random.normal(k3, (C,), jnp.float32)
        v = 0.5 + jnp.abs(jax.random.normal(k4, (C,), jnp.float32))
        return g, b, m, v

    g1, be1, m1, v1 = bn_params(ks[4], planes)
    g2, be2, m2, v2 = bn_params(ks[5], planes)
    g3, be3, m3, v3 = bn_params(ks[6], planes * 4)

    s1, bb1 = _fold_bn(g1, be1, m1, v1)
    s2, bb2 = _fold_bn(g2, be2, m2, v2)
    s3, bb3 = _fold_bn(g3, be3, m3, v3)

    fwd = jax.jit(bottleneck_forward)
    out = jax.block_until_ready(fwd(x, w1, w2, w3, s1, bb1, s2, bb2, s3, bb3))
    ref = jax.block_until_ready(
        _ref_bottleneck(x, w1, w2, w3, s1, bb1, s2, bb2, s3, bb3))

    assert out.shape == (N, planes * 4, H, W)
    err = float(jnp.max(jnp.abs(out - ref)))
    # bf16 MXU operands with f32 accumulation: tolerance loosened vs pure-f32 reference.
    assert jnp.allclose(out, ref, atol=2e-2, rtol=2e-2), f"max abs err = {err}"
    print("KERNEL_OK")
</pallas_src>

<mosaic_0001>
module attributes {stable_mosaic.version = 11 : i64} {
  func.func @_bottleneck_kernel(%arg0: i32, %arg1: memref<2x32x256xf32, #tpu.memory_space<vmem>>, %arg2: memref<8x32xbf16, #tpu.memory_space<vmem>>, %arg3: memref<8x72xbf16, #tpu.memory_space<vmem>>, %arg4: memref<32x8xbf16, #tpu.memory_space<vmem>>, %arg5: memref<8x1xf32, #tpu.memory_space<vmem>>, %arg6: memref<8x1xf32, #tpu.memory_space<vmem>>, %arg7: memref<32x1xf32, #tpu.memory_space<vmem>>, %arg8: memref<9x512xf32, #tpu.memory_space<vmem>>, %arg9: memref<2x32x256xf32, #tpu.memory_space<vmem>>) attributes {dimension_semantics = [#tpu.dimension_semantics<parallel>], iteration_bounds = array<i64: 2>, scalar_prefetch = 0 : i64, scratch_operands = 0 : i64, tpu.core_type = #tpu.core_type<tc>, window_params = [{transform_indices = @transform_0, window_bounds = array<i64: 2, 32, 256>}, {pipeline_mode = #tpu.pipeline_mode<synchronous>, transform_indices = @transform_1, window_bounds = array<i64: 8, 32>}, {pipeline_mode = #tpu.pipeline_mode<synchronous>, transform_indices = @transform_2, window_bounds = array<i64: 8, 72>}, {pipeline_mode = #tpu.pipeline_mode<synchronous>, transform_indices = @transform_3, window_bounds = array<i64: 32, 8>}, {pipeline_mode = #tpu.pipeline_mode<synchronous>, transform_indices = @transform_4, window_bounds = array<i64: 8, 1>}, {pipeline_mode = #tpu.pipeline_mode<synchronous>, transform_indices = @transform_5, window_bounds = array<i64: 8, 1>}, {pipeline_mode = #tpu.pipeline_mode<synchronous>, transform_indices = @transform_6, window_bounds = array<i64: 32, 1>}, {pipeline_mode = #tpu.pipeline_mode<synchronous>, transform_indices = @transform_7, window_bounds = array<i64: 9, 512>}, {transform_indices = @transform_8, window_bounds = array<i64: 2, 32, 256>}]} {
    %c0 = arith.constant 0 : index
    %c0_0 = arith.constant 0 : index
    %c0_1 = arith.constant 0 : index
    %0 = vector.load %arg1[%c0, %c0_0, %c0_1] : memref<2x32x256xf32, #tpu.memory_space<vmem>>, vector<1x32x256xf32>
    %1 = vector.shape_cast %0 : vector<1x32x256xf32> to vector<32x256xf32>
    %c1 = arith.constant 1 : index
    %c0_2 = arith.constant 0 : index
    %c0_3 = arith.constant 0 : index
    %2 = vector.load %arg1[%c1, %c0_2, %c0_3] : memref<2x32x256xf32, #tpu.memory_space<vmem>>, vector<1x32x256xf32>
    %3 = vector.shape_cast %2 : vector<1x32x256xf32> to vector<32x256xf32>
    %4 = tpu.concatenate %1, %3 in 1 : vector<32x256xf32>, vector<32x256xf32> -> vector<32x512xf32>
    %c0_4 = arith.constant 0 : index
    %c0_5 = arith.constant 0 : index
    %5 = vector.load %arg8[%c0_4, %c0_5] : memref<9x512xf32, #tpu.memory_space<vmem>>, vector<9x512xf32>
    %c0_6 = arith.constant 0 : index
    %c0_7 = arith.constant 0 : index
    %6 = vector.load %arg2[%c0_6, %c0_7] : memref<8x32xbf16, #tpu.memory_space<vmem>>, vector<8x32xbf16>
    %7 = arith.truncf %4 : vector<32x512xf32> to vector<32x512xbf16>
    %cst = arith.constant dense<0.000000e+00> : vector<8x512xf32>
    %8 = tpu.matmul %6, %7, %cst {dimension_numbers = #tpu.dot_dimension_numbers<[1], [0], [0], [1], [0, 0, 1, 1], [], []>} : vector<8x32xbf16>, vector<32x512xbf16>, vector<8x512xf32> -> vector<8x512xf32>
    %c0_8 = arith.constant 0 : index
    %c0_9 = arith.constant 0 : index
    %9 = vector.load %arg5[%c0_8, %c0_9] : memref<8x1xf32, #tpu.memory_space<vmem>>, vector<8x1xf32>
    %10 = vector.broadcast %9 : vector<8x1xf32> to vector<8x512xf32>
    %11 = arith.addf %8, %10 : vector<8x512xf32>
    %cst_10 = arith.constant 0.000000e+00 : f32
    %12 = vector.broadcast %cst_10 : f32 to vector<8x512xf32>
    %13 = arith.maximumf %11, %12 : vector<8x512xf32>
    %c17_i32 = arith.constant 17 : i32
    %14 = tpu.dynamic_rotate %13 by %c17_i32 dim 1 : vector<8x512xf32>, i32 -> vector<8x512xf32>
    %15 = vector.extract_strided_slice %5 {offsets = [0, 0], sizes = [1, 512], strides = [1, 1]} : vector<9x512xf32> to vector<1x512xf32>
    %16 = vector.broadcast %15 : vector<1x512xf32> to vector<8x512xf32>
    %17 = arith.mulf %14, %16 : vector<8x512xf32>
    %c16_i32 = arith.constant 16 : i32
    %18 = tpu.dynamic_rotate %13 by %c16_i32 dim 1 : vector<8x512xf32>, i32 -> vector<8x512xf32>
    %19 = vector.extract_strided_slice %5 {offsets = [1, 0], sizes = [1, 512], strides = [1, 1]} : vector<9x512xf32> to vector<1x512xf32>
    %20 = vector.broadcast %19 : vector<1x512xf32> to vector<8x512xf32>
    %21 = arith.mulf %18, %20 : vector<8x512xf32>
    %c15_i32 = arith.constant 15 : i32
    %22 = tpu.dynamic_rotate %13 by %c15_i32 dim 1 : vector<8x512xf32>, i32 -> vector<8x512xf32>
    %23 = vector.extract_strided_slice %5 {offsets = [2, 0], sizes = [1, 512], strides = [1, 1]} : vector<9x512xf32> to vector<1x512xf32>
    %24 = vector.broadcast %23 : vector<1x512xf32> to vector<8x512xf32>
    %25 = arith.mulf %22, %24 : vector<8x512xf32>
    %c1_i32 = arith.constant 1 : i32
    %26 = tpu.dynamic_rotate %13 by %c1_i32 dim 1 : vector<8x512xf32>, i32 -> vector<8x512xf32>
    %27 = vector.extract_strided_slice %5 {offsets = [3, 0], sizes = [1, 512], strides = [1, 1]} : vector<9x512xf32> to vector<1x512xf32>
    %28 = vector.broadcast %27 : vector<1x512xf32> to vector<8x512xf32>
    %29 = arith.mulf %26, %28 : vector<8x512xf32>
    %c511_i32 = arith.constant 511 : i32
    %30 = tpu.dynamic_rotate %13 by %c511_i32 dim 1 : vector<8x512xf32>, i32 -> vector<8x512xf32>
    %31 = vector.extract_strided_slice %5 {offsets = [5, 0], sizes = [1, 512], strides = [1, 1]} : vector<9x512xf32> to vector<1x512xf32>
    %32 = vector.broadcast %31 : vector<1x512xf32> to vector<8x512xf32>
    %33 = arith.mulf %30, %32 : vector<8x512xf32>
    %c497_i32 = arith.constant 497 : i32
    %34 = tpu.dynamic_rotate %13 by %c497_i32 dim 1 : vector<8x512xf32>, i32 -> vector<8x512xf32>
    %35 = vector.extract_strided_slice %5 {offsets = [6, 0], sizes = [1, 512], strides = [1, 1]} : vector<9x512xf32> to vector<1x512xf32>
    %36 = vector.broadcast %35 : vector<1x512xf32> to vector<8x512xf32>
    %37 = arith.mulf %34, %36 : vector<8x512xf32>
    %c496_i32 = arith.constant 496 : i32
    %38 = tpu.dynamic_rotate %13 by %c496_i32 dim 1 : vector<8x512xf32>, i32 -> vector<8x512xf32>
    %39 = vector.extract_strided_slice %5 {offsets = [7, 0], sizes = [1, 512], strides = [1, 1]} : vector<9x512xf32> to vector<1x512xf32>
    %40 = vector.broadcast %39 : vector<1x512xf32> to vector<8x512xf32>
    %41 = arith.mulf %38, %40 : vector<8x512xf32>
    %c495_i32 = arith.constant 495 : i32
    %42 = tpu.dynamic_rotate %13 by %c495_i32 dim 1 : vector<8x512xf32>, i32 -> vector<8x512xf32>
    %43 = vector.extract_strided_slice %5 {offsets = [8, 0], sizes = [1, 512], strides = [1, 1]} : vector<9x512xf32> to vector<1x512xf32>
    %44 = vector.broadcast %43 : vector<1x512xf32> to vector<8x512xf32>
    %45 = arith.mulf %42, %44 : vector<8x512xf32>
    %46 = tpu.concatenate %17, %21, %25, %29, %13, %33, %37, %41, %45 in 0 : vector<8x512xf32>, vector<8x512xf32>, vector<8x512xf32>, vector<8x512xf32>, vector<8x512xf32>, vector<8x512xf32>, vector<8x512xf32>, vector<8x512xf32>, vector<8x512xf32> -> vector<72x512xf32>
    %47 = arith.truncf %46 : vector<72x512xf32> to vector<72x512xbf16>
    %c0_11 = arith.constant 0 : index
    %c0_12 = arith.constant 0 : index
    %48 = vector.load %arg3[%c0_11, %c0_12] : memref<8x72xbf16, #tpu.memory_space<vmem>>, vector<8x72xbf16>
    %cst_13 = arith.constant dense<0.000000e+00> : vector<8x512xf32>
    %49 = tpu.matmul %48, %47, %cst_13 {dimension_numbers = #tpu.dot_dimension_numbers<[1], [0], [0], [1], [0, 0, 1, 1], [], []>} : vector<8x72xbf16>, vector<72x512xbf16>, vector<8x512xf32> -> vector<8x512xf32>
    %c0_14 = arith.constant 0 : index
    %c0_15 = arith.constant 0 : index
    %50 = vector.load %arg6[%c0_14, %c0_15] : memref<8x1xf32, #tpu.memory_space<vmem>>, vector<8x1xf32>
    %51 = vector.broadcast %50 : vector<8x1xf32> to vector<8x512xf32>
    %52 = arith.addf %49, %51 : vector<8x512xf32>
    %cst_16 = arith.constant 0.000000e+00 : f32
    %53 = vector.broadcast %cst_16 : f32 to vector<8x512xf32>
    %54 = arith.maximumf %52, %53 : vector<8x512xf32>
    %c0_17 = arith.constant 0 : index
    %c0_18 = arith.constant 0 : index
    %55 = vector.load %arg4[%c0_17, %c0_18] : memref<32x8xbf16, #tpu.memory_space<vmem>>, vector<32x8xbf16>
    %56 = arith.truncf %54 : vector<8x512xf32> to vector<8x512xbf16>
    %cst_19 = arith.constant dense<0.000000e+00> : vector<32x512xf32>
    %57 = tpu.matmul %55, %56, %cst_19 {dimension_numbers = #tpu.dot_dimension_numbers<[1], [0], [0], [1], [0, 0, 1, 1], [], []>} : vector<32x8xbf16>, vector<8x512xbf16>, vector<32x512xf32> -> vector<32x512xf32>
    %c0_20 = arith.constant 0 : index
    %c0_21 = arith.constant 0 : index
    %58 = vector.load %arg7[%c0_20, %c0_21] : memref<32x1xf32, #tpu.memory_space<vmem>>, vector<32x1xf32>
    %59 = vector.broadcast %58 : vector<32x1xf32> to vector<32x512xf32>
    %60 = arith.addf %57, %59 : vector<32x512xf32>
    %61 = arith.addf %60, %4 : vector<32x512xf32>
    %cst_22 = arith.constant 0.000000e+00 : f32
    %62 = vector.broadcast %cst_22 : f32 to vector<32x512xf32>
    %63 = arith.maximumf %61, %62 : vector<32x512xf32>
    %64 = vector.extract_strided_slice %63 {offsets = [0, 0], sizes = [32, 256], strides = [1, 1]} : vector<32x512xf32> to vector<32x256xf32>
    %c0_23 = arith.constant 0 : index
    %c0_24 = arith.constant 0 : index
    %c0_25 = arith.constant 0 : index
    %65 = vector.load %arg9[%c0_23, %c0_24, %c0_25] : memref<2x32x256xf32, #tpu.memory_space<vmem>>, vector<1x32x256xf32>
    %66 = vector.shape_cast %65 : vector<1x32x256xf32> to vector<32x256xf32>
    %67 = vector.shape_cast %64 : vector<32x256xf32> to vector<1x32x256xf32>
    tpu.vector_store %arg9[%c0_23, %c0_24, %c0_25], %67 {strides = array<i32>} : memref<2x32x256xf32, #tpu.memory_space<vmem>>, vector<1x32x256xf32>,
    %68 = vector.extract_strided_slice %63 {offsets = [0, 256], sizes = [32, 256], strides = [1, 1]} : vector<32x512xf32> to vector<32x256xf32>
    %c1_26 = arith.constant 1 : index
    %c0_27 = arith.constant 0 : index
    %c0_28 = arith.constant 0 : index
    %69 = vector.load %arg9[%c1_26, %c0_27, %c0_28] : memref<2x32x256xf32, #tpu.memory_space<vmem>>, vector<1x32x256xf32>
    %70 = vector.shape_cast %69 : vector<1x32x256xf32> to vector<32x256xf32>
    %71 = vector.shape_cast %68 : vector<32x256xf32> to vector<1x32x256xf32>
    tpu.vector_store %arg9[%c1_26, %c0_27, %c0_28], %71 {strides = array<i32>} : memref<2x32x256xf32, #tpu.memory_space<vmem>>, vector<1x32x256xf32>,
    return
  }
  func.func @transform_0(%arg0: i32) -> (i32, i32, i32) {
    %c0_i32 = arith.constant 0 : i32
    %c0_i32_0 = arith.constant 0 : i32
    %c0_i32_1 = arith.constant 0 : i32
    return %arg0, %c0_i32, %c0_i32_0 : i32, i32, i32
  }
  func.func @transform_1(%arg0: i32) -> (i32, i32) {
    %c0_i32 = arith.constant 0 : i32
    %c0_i32_0 = arith.constant 0 : i32
    %c0_i32_1 = arith.constant 0 : i32
    return %c0_i32, %c0_i32_0 : i32, i32
  }
  func.func @transform_2(%arg0: i32) -> (i32, i32) {
    %c0_i32 = arith.constant 0 : i32
    %c0_i32_0 = arith.constant 0 : i32
    %c0_i32_1 = arith.constant 0 : i32
    return %c0_i32, %c0_i32_0 : i32, i32
  }
  func.func @transform_3(%arg0: i32) -> (i32, i32) {
    %c0_i32 = arith.constant 0 : i32
    %c0_i32_0 = arith.constant 0 : i32
    %c0_i32_1 = arith.constant 0 : i32
    return %c0_i32, %c0_i32_0 : i32, i32
  }
  func.func @transform_4(%arg0: i32) -> (i32, i32) {
    %c0_i32 = arith.constant 0 : i32
    %c0_i32_0 = arith.constant 0 : i32
    %c0_i32_1 = arith.constant 0 : i32
    return %c0_i32, %c0_i32_0 : i32, i32
  }
  func.func @transform_5(%arg0: i32) -> (i32, i32) {
    %c0_i32 = arith.constant 0 : i32
    %c0_i32_0 = arith.constant 0 : i32
    %c0_i32_1 = arith.constant 0 : i32
    return %c0_i32, %c0_i32_0 : i32, i32
  }
  func.func @transform_6(%arg0: i32) -> (i32, i32) {
    %c0_i32 = arith.constant 0 : i32
    %c0_i32_0 = arith.constant 0 : i32
    %c0_i32_1 = arith.constant 0 : i32
    return %c0_i32, %c0_i32_0 : i32, i32
  }
  func.func @transform_7(%arg0: i32) -> (i32, i32) {
    %c0_i32 = arith.constant 0 : i32
    %c0_i32_0 = arith.constant 0 : i32
    %c0_i32_1 = arith.constant 0 : i32
    return %c0_i32, %c0_i32_0 : i32, i32
  }
  func.func @transform_8(%arg0: i32) -> (i32, i32, i32) {
    %c0_i32 = arith.constant 0 : i32
    %c0_i32_0 = arith.constant 0 : i32
    %c0_i32_1 = arith.constant 0 : i32
    return %arg0, %c0_i32, %c0_i32_0 : i32, i32, i32
  }
}

</mosaic_0001>

<bundles_post_ra>
// kernel: bottleneck_forward.1
= control target key start
LH: loop header
LB: loop body
LE: loop exit
PB: predicated region body
PF: predicated region fallthrough
CT: control target
= control target key end

     0   :  { %s1247_s27 = smov 0   ;;  %s1679_s0 = inlined_call_operand.vmem [shape: f32[4,32,256], index: 0, kind: input, shape index: {}]   ;;  %s1680_s1 = inlined_call_operand.vmem [shape: bf16[8,32], index: 1, kind: input, shape index: {}]   ;;  %s1681_s2 = inlined_call_operand.vmem [shape: bf16[8,72], index: 2, kind: input, shape index: {}]   ;;  %s1682_s3 = inlined_call_operand.vmem [shape: bf16[32,8], index: 3, kind: input, shape index: {}]   ;;  %s1683_s4 = inlined_call_operand.vmem [shape: f32[8,1], index: 4, kind: input, shape index: {}]   ;;  %s1684_s5 = inlined_call_operand.vmem [shape: f32[8,1], index: 5, kind: input, shape index: {}]   ;;  %s1685_s6 = inlined_call_operand.vmem [shape: f32[32,1], index: 6, kind: input, shape index: {}]   ;;  %s1686_s7 = inlined_call_operand.vmem [shape: f32[9,512], index: 7, kind: input, shape index: {}]   ;;  %s1687_s8 = inlined_call_operand.vmem [shape: f32[4,32,256], index: 8, kind: output, shape index: {}]  }
   0x1 LB: > { %s1115_s28 = sadd.s32 4294967295, %s1191_s27   ;;  %p1119_p0 = scmp.ge.s32.totalorder %s1191_s27, 1  ;;  %s1191_s27 = sphi %s1247_s27, %s18_s27  }
   0x2   : > { %p264_p1 = scmp.lt.s32.totalorder %s1191_s27, 3 }
   0x4   : > { %p265_p2 = pnand %p1119_p0, %p264_p1 }
   0x6   : > { %268 = sbr.rel (%p265_p2) target bundleno = 829 (0x33d), region = 52 }
   0xb   : > { %s1120_s29 = sshll.u32 %s1115_s28, 1  ;;  %v349_v0 = vld [vmem:[%s1683_s4] sm:$0xff]  ;;  %v1688_v1 = vmov 0   ;;  %vm355_vm0 = vcmask 261120   ;;  %s1194_s16 = smov 111   ;;  %v851_v46 = vld [vmem:[%s1685_s6 + $0x10] sm:$0xff]  ;;  %v453_v53 = vlaneseq }
   0xc   : > { %p301_p3 = scmp.lt.s32.totalorder %s1120_s29, 3  ;;  %391 = vmatprep.mubr.bf16.mxu0 %v1688_v1  ;;  %432 = vmatprep.mubr.bf16.mxu1 %v1688_v1  ;;  %v340_v26 = vld [vmem:[%s1680_s1] sm:$0xf]  ;;  %s1195_s17 = smov 113   ;;  %v850_v47 = vld [vmem:[%s1685_s6 + $0x8] sm:$0xff]  ;;  %v852_v48 = vld [vmem:[%s1685_s6 + $0x18] sm:$0xff] }
   0xd   : > { %1181 = vset.pattern.permute.xlu0 %v1688_v1  ;;  %1182 = vset.pattern.permute.xlu1 %v1688_v1  ;;  %s1196_s18 = smov 112   ;;  %s1197_s19 = smov 127   ;;  %v849_v44 = vld [vmem:[%s1685_s6] sm:$0xff]  ;;  %v1394_v56 = vand.u32 127, %v453_v53  ;;  %v1400_v59 = vshrl.u32 %v453_v53, 7  ;;  %vm742_vm2 = vcmask 1043456  }
   0xe   : > { %s1702_s29 = smov (!%p301_p3, %s1120_s29), 3  ;;  %352 = vperm.xlu0 %1181, %v349_v0   ;;  %s1198_s20 = smov 15   ;;  %v732_v45 = vld [vmem:[%s1684_s5] sm:$0xff]  ;;  %v1138_v60 = vld [vmem:[%s1686_s7 + $0x30] ss:$0 sm:$0xff]  ;;  %vm738_vm10 = vcmask 588800  }
   0xf   : > { %s1162_s10 = sshll.u32 %s1702_s29, 6  ;;  %s1199_s21 = smov 1   ;;  %vm686_vm1 = vcmp.lt.s32.totalorder %v1394_v56, 111  ;;  %v1139_v61 = vld [vmem:[%s1686_s7 + $0x38] ss:$0 sm:$0xff]  ;;  %vm620_vm3 = vcmp.lt.s32.totalorder %v1394_v56, 113 }
  0x10   : > { %s305_s13 = scalar_lea.vmem %s1679_s0, %s1162_s10  ;;  %s1200_s22 = smov 17   ;;  %vm653_vm4 = vcmp.lt.s32.totalorder %v1394_v56, 112  ;;  %vm587_vm5 = vcmp.lt.s32.totalorder %v1394_v56, 127  ;;  %vm521_vm6 = vcmp.lt.s32.totalorder %v1394_v56, 15  ;;  %vm554_vm7 = vcmp.lt.s32.totalorder %v1394_v56, 1 }
  0x11   : > { %v1270_v2 = vld [vmem:[%s305_s13 + $0x28] sm:$0xff]  ;;  %v1272_v3 = vld [vmem:[%s305_s13 + $0x38] sm:$0xff]  ;;  %v1280_v7 = vld [vmem:[%s305_s13 + $0x20] sm:$0xff]  ;;  %s1201_s23 = smov 16   ;;  %vm455_vm8 = vcmp.lt.s32.totalorder %v1394_v56, 17  ;;  %vm488_vm9 = vcmp.lt.s32.totalorder %v1394_v56, 16 }
  0x12   : > { %1693 = vst [vmem:[#allocation2_spill] sm:$0xff] %v1272_v3  ;;  %v1274_v4 = vld [vmem:[%s305_s13 + $0x68] sm:$0xff]  ;;  %v346_v5 = vpack.c.bf16 %v1272_v3, %v1270_v2  ;;  %v1278_v6 = vld [vmem:[%s305_s13 + $0x78] sm:$0xff]  ;;  %v1282_v8 = vld [vmem:[%s305_s13 + $0x30] sm:$0xff]  ;;  %vm883_vm11 = vcmask 64512  }
  0x13   : > { %1694 = vst [vmem:[#allocation3_spill] sm:$0xff] %v1278_v6  ;;  %v348_v9 = vpack.c.bf16 %v1278_v6, %v1274_v4  ;;  %v345_v10 = vpack.c.bf16 %v1282_v8, %v1280_v7  ;;  %v1288_v11 = vld [vmem:[%s305_s13 + $0x60] sm:$0xff]  ;;  %v1290_v12 = vld [vmem:[%s305_s13 + $0x70] sm:$0xff]  ;;  %v1292_v13 = vld [vmem:[%s305_s13 + $0x8] sm:$0xff] }
  0x14   : > { %1695 = vst [vmem:[#allocation4_spill] sm:$0xff] %v1290_v12  ;;  %371 = vmatprep.subr.bf16.mxu0 %v346_v5  ;;  %v347_v14 = vpack.c.bf16 %v1290_v12, %v1288_v11  ;;  %v1296_v15 = vld [vmem:[%s305_s13 + $0x18] sm:$0xff]  ;;  %v1298_v16 = vld [vmem:[%s305_s13 + $0x48] sm:$0xff]  ;;  %v1306_v20 = vld [vmem:[%s305_s13] sm:$0xff] }
  0x15   : > { %v1300_v17 = vld [vmem:[%s305_s13 + $0x58] sm:$0xff]  ;;  %412 = vmatprep.subr.bf16.mxu1 %v348_v9  ;;  %372 = vmatpush1.bf16.msra.mxu0 %v345_v10  ;;  %v342_v18 = vpack.c.bf16 %v1296_v15, %v1292_v13  ;;  %v1308_v21 = vld [vmem:[%s305_s13 + $0x10] sm:$0xff]  ;;  %v1310_v22 = vld [vmem:[%s305_s13 + $0x40] sm:$0xff]  ;;  %v1418_v9 = vsub.s32 6, %v1400_v59 }
  0x16   : > { %v344_v19 = vpack.c.bf16 %v1300_v17, %v1298_v16  ;;  %413 = vmatpush1.bf16.msra.mxu1 %v347_v14  ;;  %v341_v23 = vpack.c.bf16 %v1308_v21, %v1306_v20  ;;  %v1314_v24 = vld [vmem:[%s305_s13 + $0x50] sm:$0xff] }
  0x17   : > { %373 = vmatprep.subr.bf16.mxu0 %v342_v18  ;;  %v343_v25 = vpack.c.bf16 %v1314_v24, %v1310_v22  ;;  %v1423_v18 = vld [vmem:[%s1686_s7 + $0x10] sm:$0xff] }
  0x18   : > { %414 = vmatprep.subr.bf16.mxu1 %v344_v19  ;;  %v1428_v19 = vld [vmem:[%s1686_s7 + $0x18] sm:$0xff] }
  0x19   : > { %374 = vmatpush1.bf16.msra.mxu0 %v341_v23  ;;  %v1431_v23 = vsub.s32 7, %v1400_v59 }
  0x1a   : > { %415 = vmatpush1.bf16.msra.mxu1 %v343_v25 }
  0x1c   : > { %1134 = vmatmul.mubr.msk.bf16.vlgmr.msra.gmra.mxu0 %vm355_vm0, %v340_v26 }
  0x1d   : > { %1135 = vmatmul.mubr.msk.bf16.vlgmr.msra.gmra.mxu1 %vm355_vm0, %v340_v26  ;;  %787 = vmatprep.mubr.bf16.mxu0 %v1688_v1 }
  0x1e   : > { %828 = vmatprep.mubr.bf16.mxu1 %v1688_v1 }
  0x89   : > { %v353_v27 = vpop.permute.xlu0 %352 }
  0xdc   : > { %v393_v28 = vpop.f32.mrf.mxu0 }
  0xdd   : > { %v394_v29 = vadd.f32 %v393_v28, %v353_v27  ;;  %v434_v30 = vpop.f32.mrf.mxu1 }
  0xde   : > { %v435_v31 = vadd.f32 %v434_v30, %v353_v27  ;;  %v395_v32 = vpop.f32.mrf.mxu0  ;;  %v640_v30 = vrot.slane %v1428_v19, %v1418_v9 }
  0xdf   : > { %v1323_v33 = vmax.f32 %v394_v29, 0.0  ;;  %v436_v34 = vpop.f32.mrf.mxu1  ;;  %v396_v42 = vadd.f32 %v395_v32, %v353_v27  ;;  %v636_v29 = vrot.slane %v1423_v18, %v1418_v9 }
  0xe0   : > { %v1325_v35 = vmax.f32 %v435_v31, 0.0  ;;  %v397_v36 = vpop.f32.mrf.mxu0  ;;  %v437_v40 = vadd.f32 %v436_v34, %v353_v27  ;;  %v1441_v31 = vsub.s32 5, %v1400_v59  ;;  %v669_v34 = vrot.slane %v1423_v18, %v1431_v23 }
  0xe1   : > { %v438_v37 = vpop.f32.mrf.mxu1  ;;  %678 = vrot.lane.b32.xlu0 %v1323_v33, %s1194_s16  ;;  %v1348_v43 = vmax.f32 %v396_v42, 0.0  ;;  %v673_v36 = vrot.slane %v1428_v19, %v1431_v23 }
  0xe2   : > { %682 = vrot.lane.b32.xlu1 %v1325_v35, %s1194_s16  ;;  %v398_v38 = vpop.f32.mrf.mxu0  ;;  %v1337_v41 = vmax.f32 %v437_v40, 0.0 }
  0xe3   : > { %v439_v39 = vpop.f32.mrf.mxu1 }
  0xe5   : > { %616 = vrot.lane.b32.xlu0 %v1325_v35, %s1195_s17 }
  0xe6   : > { %612 = vrot.lane.b32.xlu1 %v1323_v33, %s1195_s17 }
  0xe9   : > { %649 = vrot.lane.b32.xlu0 %v1325_v35, %s1196_s18 }
  0xea   : > { %645 = vrot.lane.b32.xlu1 %v1323_v33, %s1196_s18 }
  0xed   : > { %583 = vrot.lane.b32.xlu0 %v1325_v35, %s1197_s19 }
  0xee   : > { %579 = vrot.lane.b32.xlu1 %v1323_v33, %s1197_s19 }
  0xf1   : > { %684 = vrot.lane.b32.xlu0 %v1337_v41, %s1194_s16 }
  0xf2   : > { %513 = vrot.lane.b32.xlu1 %v1323_v33, %s1198_s20 }
  0xf5   : > { %618 = vrot.lane.b32.xlu0 %v1337_v41, %s1195_s17 }
  0xf6   : > { %546 = vrot.lane.b32.xlu1 %v1323_v33, %s1199_s21 }
  0xf9   : > { %651 = vrot.lane.b32.xlu0 %v1337_v41, %s1196_s18 }
  0xfa   : > { %517 = vrot.lane.b32.xlu1 %v1325_v35, %s1198_s20 }
  0xfd   : > { %585 = vrot.lane.b32.xlu0 %v1337_v41, %s1197_s19 }
  0xfe   : > { %550 = vrot.lane.b32.xlu1 %v1325_v35, %s1199_s21 }
 0x101   : > { %515 = vrot.lane.b32.xlu0 %v1348_v43, %s1198_s20 }
 0x102   : > { %445 = vrot.lane.b32.xlu1 %v1323_v33, %s1200_s22 }
 0x105   : > { %548 = vrot.lane.b32.xlu0 %v1348_v43, %s1199_s21 }
 0x106   : > { %680 = vrot.lane.b32.xlu1 %v1348_v43, %s1194_s16 }
 0x109   : > { %519 = vrot.lane.b32.xlu0 %v1337_v41, %s1198_s20  ;;  %s1643_s20 = scalar_lea.vmem %s1687_s8, %s1162_s10 }
 0x10a   : > { %614 = vrot.lane.b32.xlu1 %v1348_v43, %s1195_s17 }
 0x10d   : > { %552 = vrot.lane.b32.xlu0 %v1337_v41, %s1199_s21 }
 0x10e   : > { %647 = vrot.lane.b32.xlu1 %v1348_v43, %s1196_s18 }
 0x111   : > { %447 = vrot.lane.b32.xlu0 %v1348_v43, %s1200_s22 }
 0x112   : > { %581 = vrot.lane.b32.xlu1 %v1348_v43, %s1197_s19 }
 0x115   : > { %482 = vrot.lane.b32.xlu0 %v1348_v43, %s1201_s23 }
 0x116   : > { %480 = vrot.lane.b32.xlu1 %v1323_v33, %s1201_s23 }
 0x119   : > { %451 = vrot.lane.b32.xlu0 %v1337_v41, %s1200_s22 }
 0x11a   : > { %449 = vrot.lane.b32.xlu1 %v1325_v35, %s1200_s22 }
 0x11d   : > { %486 = vrot.lane.b32.xlu0 %v1337_v41, %s1201_s23 }
 0x11e   : > { %484 = vrot.lane.b32.xlu1 %v1325_v35, %s1201_s23 }
 0x121   : > { %855 = vperm.xlu0 %1181, %v849_v44  }
 0x122   : > { %735 = vperm.xlu1 %1182, %v732_v45   ;;  %v603_v45 = vrot.slane %v1423_v18, %v1441_v31 }
 0x125   : > { %865 = vperm.xlu0 %1181, %v851_v46   ;;  %v607_v46 = vrot.slane %v1428_v19, %v1441_v31 }
 0x126   : > { %860 = vperm.xlu1 %1182, %v850_v47  }
 0x12a   : > { %870 = vperm.xlu1 %1182, %v852_v48  }
 0x153   : > { %v1382_v49 = vpop.permute.xlu0 %678 }
 0x154   : > { %v1384_v50 = vpop.permute.xlu1 %682 }
 0x157   : > { %v1386_v51 = vpop.permute.xlu0 %616 }
 0x158   : > { %v1388_v52 = vpop.permute.xlu1 %612 }
 0x15b   : > { %v1390_v54 = vpop.permute.xlu0 %649 }
 0x15c   : > { %v1392_v55 = vpop.permute.xlu1 %645 }
 0x15f   : > { %v1396_v57 = vpop.permute.xlu0 %583 }
 0x160   : > { %v1398_v58 = vpop.permute.xlu1 %579 }
 0x163   : > { %v685_v62 = vpop.permute.xlu0 %684 }
 0x164   : > { %v1409_v63 = vpop.permute.xlu1 %513  ;;  %v687_v0 = vsel %vm686_vm1, %v1384_v50, %v685_v62  ;;  %v690_v5 = vsel %vm686_vm1, %v685_v62, %v1382_v49 }
 0x165   : > { %v709_v10 = vmul.f32 %v1138_v60, %v687_v0  ;;  %v710_v14 = vmul.f32 %v1139_v61, %v690_v5 }
 0x167   : > { %v729_v25 = vpack.c.bf16 %v709_v10, %v709_v10  ;;  %v730_v26 = vpack.c.bf16 %v710_v14, %v710_v14  ;;  %v619_v27 = vpop.permute.xlu0 %618 }
 0x168   : > { %v1434_v28 = vpop.permute.xlu1 %546  ;;  %v621_v37 = vsel %vm620_vm3, %v1386_v51, %v619_v27  ;;  %v624_v38 = vsel %vm620_vm3, %v619_v27, %v1388_v52 }
 0x169   : > { %1142 = vmatprep.subr.msk.bf16.mxu1 %vm742_vm2, %v730_v26  ;;  %v750_v32 = vsel %vm742_vm2, %v729_v25, 0  ;;  %v643_v47 = vmul.f32 %v636_v29, %v621_v37  ;;  %v644_v48 = vmul.f32 %v640_v30, %v624_v38  ;;  %v1494_v37 = vsub.s32 3, %v1400_v59 }
 0x16a   : > { %803 = vmatpush1.bf16.msra.mxu1 %v750_v32 }
 0x16b   : > { %v652_v39 = vpop.permute.xlu0 %651 }
 0x16c   : > { %v518_v40 = vpop.permute.xlu1 %517  ;;  %v654_v42 = vsel %vm653_vm4, %v1390_v54, %v652_v39  ;;  %v657_v44 = vsel %vm653_vm4, %v652_v39, %v1392_v55 }
 0x16d   : > { %v676_v53 = vmul.f32 %v669_v34, %v654_v42  ;;  %v677_v60 = vmul.f32 %v673_v36, %v657_v44  ;;  %v1480_v34 = vsub.s32 2, %v1400_v59  ;;  %v1485_v36 = vld [vmem:[%s1686_s7 + $0x8] sm:$0xff]  ;;  %v1499_v42 = vld [vmem:[%s1686_s7] sm:$0xff] }
 0x16f   : > { %v725_v61 = vpack.c.bf16 %v676_v53, %v643_v47  ;;  %v586_v62 = vpop.permute.xlu0 %585  ;;  %v726_v0 = vpack.c.bf16 %v677_v60, %v644_v48  ;;  %v537_v53 = vrot.slane %v1423_v18, %v1480_v34  ;;  %v566_v60 = vrot.slane %v1485_v36, %v1494_v37 }
 0x170   : > { %v551_v5 = vpop.permute.xlu1 %550  ;;  %v588_v10 = vsel %vm587_vm5, %v1396_v57, %v586_v62  ;;  %v591_v14 = vsel %vm587_vm5, %v586_v62, %v1398_v58 }
 0x171   : > { %v610_v25 = vmul.f32 %v603_v45, %v588_v10  ;;  %v611_v26 = vmul.f32 %v607_v46, %v591_v14  ;;  %804 = vmatprep.subr.bf16.mxu1 %v726_v0  ;;  %v632_v10 = vrot.slane %v1485_v36, %v1418_v9 }
 0x172   : > { %805 = vmatpush1.bf16.msra.mxu1 %v725_v61  ;;  %v628_v61 = vrot.slane %v1499_v42, %v1418_v9 }
 0x173   : > { %v721_v27 = vpack.c.bf16 %v610_v25, %v1325_v35  ;;  %v1474_v29 = vpop.permute.xlu0 %515  ;;  %v722_v30 = vpack.c.bf16 %v611_v26, %v1337_v41  ;;  %v1136_v35 = vld [vmem:[%s1686_s7 + $0x20] ss:$0 sm:$0xff]  ;;  %v1137_v41 = vld [vmem:[%s1686_s7 + $0x28] ss:$0 sm:$0xff]  ;;  %v541_v25 = vrot.slane %v1428_v19, %v1480_v34 }
 0x174   : > { %v1477_v32 = vpop.permute.xlu1 %445  ;;  %v523_v26 = vsel %vm521_vm6, %v1474_v29, %v518_v40 }
 0x175   : > { %806 = vmatprep.subr.bf16.mxu1 %v722_v30  ;;  %v661_v30 = vrot.slane %v1499_v42, %v1431_v23 }
 0x176   : > { %807 = vmatpush1.bf16.msra.mxu1 %v721_v27 }
 0x177   : > { %v549_v38 = vpop.permute.xlu0 %548 }
 0x178   : > { %v681_v39 = vpop.permute.xlu1 %680  ;;  %v556_v27 = vsel %vm554_vm7, %v549_v38, %v551_v5 }
 0x179   : > { %v688_v44 = vsel %vm686_vm1, %v681_v39, %v1384_v50  ;;  %v689_v45 = vsel %vm686_vm1, %v1382_v49, %v681_v39  ;;  %v570_v50 = vrot.slane %v1423_v18, %v1494_v37  ;;  %v665_v39 = vrot.slane %v1485_v36, %v1431_v23 }
 0x17a   : > { %v707_v47 = vmul.f32 %v1136_v35, %v689_v45  ;;  %v708_v48 = vmul.f32 %v1137_v41, %v688_v44  ;;  %v574_v35 = vrot.slane %v1428_v19, %v1494_v37  ;;  %v595_v44 = vrot.slane %v1499_v42, %v1441_v31 }
 0x17b   : > { %v520_v49 = vpop.permute.xlu0 %519  ;;  %v544_v23 = vmul.f32 %v537_v53, %v523_v26  ;;  %v577_v1 = vmul.f32 %v570_v50, %v556_v27 }
 0x17c   : > { %v727_v62 = vpack.c.bf16 %v707_v47, %v707_v47  ;;  %v728_v0 = vpack.c.bf16 %v708_v48, %v708_v48  ;;  %v615_v14 = vpop.permute.xlu1 %614  ;;  %v522_v9 = vsel %vm521_vm6, %v518_v40, %v520_v49  ;;  %v599_v48 = vrot.slane %v1485_v36, %v1441_v31 }
 0x17d   : > { %v622_v45 = vsel %vm620_vm3, %v615_v14, %v1386_v51  ;;  %v623_v47 = vsel %vm620_vm3, %v1388_v52, %v615_v14  ;;  %v545_v6 = vmul.f32 %v541_v25, %v522_v9  ;;  %v717_v27 = vpack.c.bf16 %v577_v1, %v544_v23 }
 0x17e   : > { %1140 = vmatprep.subr.msk.bf16.mxu0 %vm742_vm2, %v728_v0  ;;  %v744_v41 = vsel %vm742_vm2, %v727_v62, 0  ;;  %v1549_v62 = vsub.s32 1, %v1400_v59  ;;  %v557_v0 = vsel %vm554_vm7, %v1434_v28, %v549_v38  ;;  %v641_v53 = vmul.f32 %v628_v61, %v623_v47 }
 0x17f   : > { %762 = vmatpush1.bf16.msra.mxu0 %v744_v41  ;;  %v553_v40 = vpop.permute.xlu0 %552  ;;  %v642_v26 = vmul.f32 %v632_v10, %v622_v45  ;;  %v562_v38 = vrot.slane %v1499_v42, %v1494_v37  ;;  %v576_v61 = vmul.f32 %v566_v60, %v557_v0 }
 0x180   : > { %v648_v46 = vpop.permute.xlu1 %647  ;;  %v555_v51 = vsel %vm554_vm7, %v551_v5, %v553_v40  ;;  %v462_v5 = vsub.s32 0, %v1400_v59  ;;  %v496_v0 = vrot.slane %v1499_v42, %v1549_v62 }
 0x181   : > { %v655_v52 = vsel %vm653_vm4, %v648_v46, %v1390_v54  ;;  %v656_v31 = vsel %vm653_vm4, %v1392_v55, %v648_v46  ;;  %v578_v14 = vmul.f32 %v574_v35, %v555_v51  ;;  %v500_v55 = vrot.slane %v1485_v36, %v1549_v62 }
 0x182   : > { %v674_v41 = vmul.f32 %v661_v30, %v656_v31  ;;  %v675_v3 = vmul.f32 %v665_v39, %v655_v52  ;;  %v524_v46 = vsel %vm521_vm6, %v1409_v63, %v1474_v29  ;;  %v529_v29 = vrot.slane %v1499_v42, %v1480_v34 }
 0x183   : > { %v448_v50 = vpop.permute.xlu0 %447  ;;  %v718_v25 = vpack.c.bf16 %v578_v14, %v545_v6  ;;  %v475_v23 = vrot.slane %v1428_v19, %v462_v5  ;;  %v504_v52 = vrot.slane %v1423_v18, %v1549_v62  ;;  %v508_v14 = vrot.slane %v1428_v19, %v1549_v62 }
 0x184   : > { %v723_v54 = vpack.c.bf16 %v674_v41, %v641_v53  ;;  %v582_v9 = vpop.permute.xlu1 %581  ;;  %v724_v12 = vpack.c.bf16 %v675_v3, %v642_v26  ;;  %v558_v3 = vsel %vm554_vm7, %v553_v40, %v1434_v28  ;;  %v525_v28 = vsel %vm521_vm6, %v520_v49, %v1409_v63 }
 0x185   : > { %v589_v37 = vsel %vm587_vm5, %v582_v9, %v1396_v57  ;;  %v590_v1 = vsel %vm587_vm5, %v1398_v58, %v582_v9  ;;  %808 = vmatprep.subr.bf16.mxu1 %v718_v25  ;;  %v467_v57 = vrot.slane %v1485_v36, %v462_v5  ;;  %v1696_v58 = vrot.slane %v1485_v36, %v1480_v34 }
 0x186   : > { %v608_v6 = vmul.f32 %v595_v44, %v590_v1  ;;  %v609_v59 = vmul.f32 %v599_v48, %v589_v37  ;;  %763 = vmatprep.subr.bf16.mxu0 %v724_v12  ;;  %809 = vmatpush1.bf16.msra.mxu1 %v717_v27  ;;  %v575_v39 = vmul.f32 %v562_v38, %v558_v3 }
 0x187   : > { %764 = vmatpush1.bf16.msra.mxu0 %v723_v54  ;;  %v483_v60 = vpop.permute.xlu0 %482  ;;  %v543_v10 = vmul.f32 %v1696_v58, %v524_v46  ;;  %v458_v44 = vsel %vm455_vm8, %v1477_v32, %v448_v50  ;;  %v542_v36 = vmul.f32 %v529_v29, %v525_v28  ;;  %v463_v48 = vrot.slane %v1499_v42, %v462_v5  ;;  %v731_v46 = vld [vmem:[%s1681_s2] sm:$0xf] }
 0x188   : > { %v719_v12 = vpack.c.bf16 %v608_v6, %v1323_v33  ;;  %v481_v30 = vpop.permute.xlu1 %480  ;;  %v720_v35 = vpack.c.bf16 %v609_v59, %v1348_v43  ;;  %v477_v63 = vmul.f32 %v467_v57, %v458_v44  ;;  %v471_v33 = vrot.slane %v1423_v18, %v462_v5 }
 0x189   : > { %v491_v45 = vsel %vm488_vm9, %v481_v30, %v483_v60  ;;  %v716_v34 = vpack.c.bf16 %v576_v61, %v543_v10  ;;  %v715_v43 = vpack.c.bf16 %v575_v39, %v542_v36  ;;  %v1697_v61 = vmov 0  }
 0x18a   : > { %v510_v47 = vmul.f32 %v500_v55, %v491_v45  ;;  %765 = vmatprep.subr.bf16.mxu0 %v720_v35 }
 0x18b   : > { %766 = vmatpush1.bf16.msra.mxu0 %v719_v12  ;;  %v452_v40 = vpop.permute.xlu0 %451 }
 0x18c   : > { %v450_v49 = vpop.permute.xlu1 %449  ;;  %767 = vmatprep.subr.bf16.mxu0 %v716_v34  ;;  %v459_v51 = vsel %vm455_vm8, %v452_v40, %v1477_v32  ;;  %v712_v31 = vpack.c.bf16 %v510_v47, %v477_v63  ;;  %v1183_v63 = vld [vmem:[%s1682_s3] sm:$0xff]  }
 0x18d   : > { %v457_v53 = vsel %vm455_vm8, %v448_v50, %v450_v49  ;;  %v456_v26 = vsel %vm455_vm8, %v450_v49, %v452_v40  ;;  %v476_v38 = vmul.f32 %v463_v48, %v459_v51  ;;  %v1184_v49 = vld [vmem:[%s1682_s3 + $0x8] sm:$0xff]  }
 0x18e   : > { %v478_v5 = vmul.f32 %v471_v33, %v457_v53  ;;  %v479_v50 = vmul.f32 %v475_v23, %v456_v26 }
 0x18f   : > { %768 = vmatpush1.bf16.msra.mxu0 %v715_v43  ;;  %v487_v41 = vpop.permute.xlu0 %486 }
 0x190   : > { %v485_v42 = vpop.permute.xlu1 %484  ;;  %769 = vmatprep.subr.bf16.mxu0 %v712_v31  ;;  %v492_v32 = vsel %vm488_vm9, %v487_v41, %v481_v30 }
 0x191   : > { %v490_v18 = vsel %vm488_vm9, %v483_v60, %v485_v42  ;;  %v489_v19 = vsel %vm488_vm9, %v485_v42, %v487_v41  ;;  %v509_v62 = vmul.f32 %v496_v0, %v492_v32 }
 0x192   : > { %v511_v25 = vmul.f32 %v504_v52, %v490_v18  ;;  %v512_v27 = vmul.f32 %v508_v14, %v489_v19 }
 0x193   : > { %v711_v54 = vpack.c.bf16 %v509_v62, %v476_v38 }
 0x194   : > { %v713_v9 = vpack.c.bf16 %v511_v25, %v478_v5  ;;  %v714_v55 = vpack.c.bf16 %v512_v27, %v479_v50 }
 0x195   : > { %770 = vmatpush1.bf16.msra.mxu0 %v711_v54 }
 0x196   : > { %810 = vmatprep.subr.bf16.mxu1 %v714_v55 }
 0x197   : > { %811 = vmatpush1.bf16.msra.mxu1 %v713_v9 }
 0x198   : > { %1141 = vmatmul.mubr.msk.bf16.vlgmr.msra.gmra.mxu0 %vm738_vm10, %v731_v46 }
 0x199   : > { %934 = vmatprep.mubr.bf16.mxu0 %v1697_v61 }
 0x19a   : > { %1143 = vmatmul.mubr.msk.bf16.vlgmr.msra.gmra.mxu1 %vm738_vm10, %v731_v46 }
 0x19b   : > { %987 = vmatprep.mubr.bf16.mxu1 %v1697_v61 }
 0x19c   : > { %v856_v43 = vpop.permute.xlu0 %855 }
 0x19d   : > { %v736_v56 = vpop.permute.xlu1 %735 }
 0x1a0   : > { %v866_v5 = vpop.permute.xlu0 %865 }
 0x1a1   : > { %v861_v41 = vpop.permute.xlu1 %860 }
 0x258   : > { %v789_v37 = vpop.f32.mrf.mxu0 }
 0x259   : > { %v790_v1 = vadd.f32 %v789_v37, %v736_v56 }
 0x25a   : > { %v830_v3 = vpop.f32.mrf.mxu1  ;;  %v791_v6 = vpop.f32.mrf.mxu0 }
 0x25b   : > { %v837_v59 = vmax.f32 %v790_v1, 0.0  ;;  %v831_v29 = vadd.f32 %v830_v3, %v736_v56  ;;  %v792_v57 = vadd.f32 %v791_v6, %v736_v56 }
 0x25c   : > { %v832_v60 = vpop.f32.mrf.mxu1  ;;  %v793_v58 = vpop.f32.mrf.mxu0 }
 0x25d   : > { %v845_v10 = vpack.c.bf16 %v837_v59, %v837_v59  ;;  %v839_v28 = vmax.f32 %v831_v29, 0.0  ;;  %v838_v12 = vmax.f32 %v792_v57, 0.0  ;;  %v833_v30 = vadd.f32 %v832_v60, %v736_v56 }
 0x25e   : > { %v834_v35 = vpop.f32.mrf.mxu1  ;;  %v794_v39 = vpop.f32.mrf.mxu0 }
 0x25f   : > { %v847_v44 = vpack.c.bf16 %v839_v28, %v839_v28  ;;  %v846_v45 = vpack.c.bf16 %v838_v12, %v838_v12  ;;  %v840_v47 = vmax.f32 %v833_v30, 0.0  ;;  %v891_v40 = vsel %vm742_vm2, %v845_v10, 0  ;;  %v871_v28 = vpop.permute.xlu1 %870 }
 0x260   : > { %v835_v34 = vpop.f32.mrf.mxu1 }
 0x261   : > { %v848_v36 = vpack.c.bf16 %v840_v47, %v840_v47  ;;  %1146 = vmatprep.subr.msk.bf16.mxu0 %vm742_vm2, %v846_v45  ;;  %v897_v33 = vsel %vm742_vm2, %v847_v44, 0 }
 0x262   : > { %917 = vmatpush1.bf16.msra.mxu0 %v891_v40 }
 0x263   : > { %1149 = vmatprep.subr.msk.bf16.mxu1 %vm742_vm2, %v848_v36 }
 0x264   : > { %970 = vmatpush1.bf16.msra.mxu1 %v897_v33  ;;  %v1698_v33 = vld [vmem:[#allocation4_spill] sm:$0xff] }
 0x265   : > { %1147 = vmatmul.mubr.msk.bf16.vlgmr.msra.gmra.mxu0 %vm883_vm11, %v1183_v63 }
 0x266   : > { %944 = vmatprep.mubr.bf16.mxu0 %v1697_v61 }
 0x267   : > { %1150 = vmatmul.mubr.msk.bf16.vlgmr.msra.gmra.mxu1 %vm883_vm11, %v1183_v63 }
 0x268   : > { %997 = vmatprep.mubr.bf16.mxu1 %v1697_v61 }
 0x26d   : > { %1148 = vmatmul.mubr.msk.bf16.gmra.mxu0 %vm883_vm11, %v1184_v49 }
 0x26f   : > { %1151 = vmatmul.mubr.msk.bf16.gmra.mxu1 %vm883_vm11, %v1184_v49 }
 0x325   : > { %v936_v48 = vpop.f32.mrf.mxu0 }
 0x326   : > { %v937_v23 = vadd.f32 %v936_v48, %v856_v43 }
 0x327   : > { %v989_v0 = vpop.f32.mrf.mxu1  ;;  %v938_v51 = vpop.f32.mrf.mxu0 }
 0x328   : > { %v1008_v52 = vadd.f32 %v937_v23, %v1306_v20  ;;  %v990_v31 = vadd.f32 %v989_v0, %v856_v43  ;;  %v939_v14 = vadd.f32 %v938_v51, %v856_v43 }
 0x329   : > { %v991_v53 = vpop.f32.mrf.mxu1  ;;  %v940_v26 = vpop.f32.mrf.mxu0 }
 0x32a   : > { %v1024_v42 = vmax.f32 %v1008_v52, 0.0  ;;  %v1010_v32 = vadd.f32 %v1310_v22, %v990_v31  ;;  %v1009_v38 = vadd.f32 %v939_v14, %v1292_v13  ;;  %v992_v20 = vadd.f32 %v991_v53, %v856_v43  ;;  %v1699_v43 = vld [vmem:[#allocation2_spill] sm:$0xff]  ;;  %v1700_v52 = vld [vmem:[#allocation3_spill] sm:$0xff] }
 0x32b   : > { %v941_v18 = vadd.f32 %v940_v26, %v861_v41  ;;  %v993_v19 = vpop.f32.mrf.mxu1  ;;  %v942_v62 = vpop.f32.mrf.mxu0 }
 0x32c   : > { %1040 = vst [vmem:[%s1643_s20] sm:$0xff] %v1024_v42  ;;  %v1026_v50 = vmax.f32 %v1010_v32, 0.0  ;;  %v1025_v25 = vmax.f32 %v1009_v38, 0.0  ;;  %v1011_v27 = vadd.f32 %v1298_v16, %v992_v20  ;;  %v994_v54 = vadd.f32 %v993_v19, %v861_v41 }
 0x32d   : > { %v1012_v9 = vadd.f32 %v941_v18, %v1308_v21  ;;  %v943_v55 = vadd.f32 %v942_v62, %v861_v41  ;;  %v995_v22 = vpop.f32.mrf.mxu1  ;;  %v946_v46 = vpop.f32.mrf.mxu0 }
 0x32e   : > { %1152 = vst [vmem:[%s1643_s20 + $0x40] sm:$0xff] %v1026_v50  ;;  %1041 = vst [vmem:[%s1643_s20 + $0x8] sm:$0xff] %v1025_v25  ;;  %v1027_v13 = vmax.f32 %v1011_v27, 0.0  ;;  %v1014_v61 = vadd.f32 %v1314_v24, %v994_v54  ;;  %v996_v56 = vadd.f32 %v995_v22, %v861_v41  ;;  %v947_v37 = vadd.f32 %v946_v46, %v866_v5 }
 0x32f   : > { %v1028_v1 = vmax.f32 %v1012_v9, 0.0  ;;  %v1013_v3 = vadd.f32 %v943_v55, %v1296_v15  ;;  %v999_v16 = vpop.f32.mrf.mxu1  ;;  %v948_v6 = vpop.f32.mrf.mxu0 }
 0x330   : > { %1153 = vst [vmem:[%s1643_s20 + $0x48] sm:$0xff] %v1027_v13  ;;  %v1030_v21 = vmax.f32 %v1014_v61, 0.0  ;;  %v1015_v59 = vadd.f32 %v1300_v17, %v996_v56  ;;  %v1016_v29 = vadd.f32 %v947_v37, %v1280_v7  ;;  %v1000_v57 = vadd.f32 %v999_v16, %v866_v5 }
 0x331   : > { %1042 = vst [vmem:[%s1643_s20 + $0x10] sm:$0xff] %v1028_v1  ;;  %v1029_v60 = vmax.f32 %v1013_v3, 0.0  ;;  %v949_v24 = vadd.f32 %v948_v6, %v866_v5  ;;  %v1001_v58 = vpop.f32.mrf.mxu1  ;;  %v950_v10 = vpop.f32.mrf.mxu0 }
 0x332   : > { %1154 = vst [vmem:[%s1643_s20 + $0x50] sm:$0xff] %v1030_v21  ;;  %v1031_v15 = vmax.f32 %v1015_v59, 0.0  ;;  %v1032_v12 = vmax.f32 %v1016_v29, 0.0  ;;  %v1018_v30 = vadd.f32 %v1288_v11, %v1000_v57  ;;  %v1002_v35 = vadd.f32 %v1001_v58, %v866_v5 }
 0x333   : > { %1043 = vst [vmem:[%s1643_s20 + $0x18] sm:$0xff] %v1029_v60  ;;  %v1017_v17 = vadd.f32 %v949_v24, %v1270_v2  ;;  %v951_v7 = vadd.f32 %v950_v10, %v871_v28  ;;  %v1003_v39 = vpop.f32.mrf.mxu1  ;;  %v952_v44 = vpop.f32.mrf.mxu0 }
 0x334   : > { %1155 = vst [vmem:[%s1643_s20 + $0x58] sm:$0xff] %v1031_v15  ;;  %1044 = vst [vmem:[%s1643_s20 + $0x20] sm:$0xff] %v1032_v12  ;;  %v1034_v45 = vmax.f32 %v1018_v30, 0.0  ;;  %v1019_v47 = vadd.f32 %v1274_v4, %v1002_v35  ;;  %v1004_v34 = vadd.f32 %v1003_v39, %v871_v28  ;;  %v953_v36 = vadd.f32 %v952_v44, %v871_v28 }
 0x335   : > { %v1033_v11 = vmax.f32 %v1017_v17, 0.0  ;;  %v1020_v40 = vadd.f32 %v951_v7, %v1282_v8  ;;  %v1005_v63 = vpop.f32.mrf.mxu1 }
 0x336   : > { %1156 = vst [vmem:[%s1643_s20 + $0x60] sm:$0xff] %v1034_v45  ;;  %v1035_v2 = vmax.f32 %v1019_v47, 0.0  ;;  %v1022_v49 = vadd.f32 %v1698_v33, %v1004_v34  ;;  %v1021_v48 = vadd.f32 %v953_v36, %v1699_v43  ;;  %v1006_v23 = vadd.f32 %v1005_v63, %v871_v28 }
 0x337   : > { %1045 = vst [vmem:[%s1643_s20 + $0x28] sm:$0xff] %v1033_v11  ;;  %v1036_v0 = vmax.f32 %v1020_v40, 0.0 }
 0x338   : > { %1157 = vst [vmem:[%s1643_s20 + $0x68] sm:$0xff] %v1035_v2  ;;  %v1038_v4 = vmax.f32 %v1022_v49, 0.0  ;;  %v1037_v51 = vmax.f32 %v1021_v48, 0.0  ;;  %v1023_v31 = vadd.f32 %v1700_v52, %v1006_v23 }
 0x339   : > { %1046 = vst [vmem:[%s1643_s20 + $0x30] sm:$0xff] %v1036_v0 }
 0x33a   : > { %1158 = vst [vmem:[%s1643_s20 + $0x70] sm:$0xff] %v1038_v4  ;;  %1047 = vst [vmem:[%s1643_s20 + $0x38] sm:$0xff] %v1037_v51  ;;  %v1039_v8 = vmax.f32 %v1023_v31, 0.0 }
 0x33c   : > { %1159 = vst [vmem:[%s1643_s20 + $0x78] sm:$0xff] %v1039_v8 }
 0x33d PF: > { %s18_s27 = sadd.s32 1, %s1191_s27  }
 0x33e   : > { %p15_p4 = scmp.ge.s32.totalorder %s18_s27, 4  }
 0x340   :  { %17 = sbr.rel (!%p15_p4) target bundleno = 1 (0x1), region = 84 }

</bundles_post_ra>
